<compile_context>
chip_gen: v7x
topology: tpu7x:2x2x1
jax: 0.10.0
libtpu: 0.0.40
codegen_flags: <defaults>
</compile_context>

<pallas_src>
import functools

import jax
import jax.numpy as jnp
import numpy as np
from jax.experimental import pallas as pl
from jax.experimental.pallas import tpu as pltpu


def _round_up(x, m):
    return ((x + m - 1) // m) * m


def _gram_kernel(t_ref, s_ref, gram_ref, z_ref, *, nf, r_off, tk, p_cols,
                 nk_per):
    c = pl.program_id(0)   # TensorCore split (parallel)
    k = pl.program_id(1)   # folded-P tile index within this split (arbitrary)

    @pl.when(k == 0)
    def _init():
        gram_ref[...] = jnp.zeros_like(gram_ref)

    if r_off > nf:
        # Padding rows between the teacher and student blocks (only when the
        # student offset had to be rounded up to a sublane boundary).
        @pl.when(k == 0)
        def _zero_pad():
            z_ref[nf:r_off, :] = jnp.zeros((r_off - nf, tk), dtype=z_ref.dtype)

    # Stage both tiles into a single fused operand: one Z @ Z^T per step.
    z_ref[0:nf, :] = t_ref[...]
    z_ref[r_off:r_off + nf, :] = s_ref[...]

    g = c * nk_per + k            # global tile index along the folded P axis
    rem = p_cols - g * tk         # number of valid lanes in this tile
    dn = (((1,), (1,)), ((), ()))  # contract lanes of both operands: Z @ Z^T

    @pl.when(rem >= tk)
    def _full_tile():
        z = z_ref[...]
        gram_ref[0] += jax.lax.dot_general(
            z, z, dimension_numbers=dn, preferred_element_type=jnp.float32)

    @pl.when(rem < tk)
    def _partial_tile():
        # Boundary (or clamped ghost) tile: mask the out-of-range lanes.
        z = z_ref[...]
        lane = jax.lax.broadcasted_iota(jnp.int32, z.shape, 1)
        z = jnp.where(lane < rem, z, jnp.zeros_like(z))
        gram_ref[0] += jax.lax.dot_general(
            z, z, dimension_numbers=dn, preferred_element_type=jnp.float32)


def center_kernel_alignment_seg(student_logits, teacher_logits, *,
                                intra_weight=15.0, with_l2_norm=True,
                                max_tile_cols=None):
    """Forward pass of CenterKernelAlignmentSeg (default module args)."""
    n = student_logits.shape[0]
    assert teacher_logits.shape[0] == n
    s2d = student_logits.reshape(n, -1)
    t2d = teacher_logits.reshape(n, -1)
    p = s2d.shape[1]
    assert t2d.shape[1] == p and p > 0

    # Stream f32 / bf16 natively (no extra HBM copies); promote anything else.
    f32 = jnp.dtype(jnp.float32)
    bf16 = jnp.dtype(jnp.bfloat16)
    if s2d.dtype != t2d.dtype or s2d.dtype not in (f32, bf16):
        s2d = s2d.astype(jnp.float32)
        t2d = t2d.astype(jnp.float32)
    dtype = s2d.dtype
    itemsize = jnp.dtype(dtype).itemsize
    sub_q = 8 if itemsize == 4 else 16   # sublane packing quantum

    # Fold rows into sublanes: (N, P) -> (N*F, P/F), free row-major reshape.
    fold = 1
    for f in (8, 4, 2):
        if p % f == 0:
            fold = f
            break
    nf = n * fold
    p_cols = p // fold
    t_f = t2d.reshape(nf, p_cols)
    s_f = s2d.reshape(nf, p_cols)

    r_off = _round_up(nf, 8)     # sublane-aligned row offset of the student block
    z_rows = r_off + nf          # fused operand rows / gram size

    # ---- tile sizing: biggest lane-dense tile that fits a per-generation VMEM
    # budget, capped so each step moves at most ~16 MiB of HBM.
    try:
        vmem_cap = int(pltpu.get_tpu_info().vmem_capacity_bytes)
    except Exception:  # pragma: no cover - conservative fallback
        vmem_cap = 64 * 1024 * 1024
    vmem_budget = int(vmem_cap * 0.60)
    vmem_limit = int(vmem_cap * 0.78)

    in_rows = _round_up(nf, sub_q)       # physical sublanes of one input block
    z_rows_pad = _round_up(z_rows, sub_q)
    # 2 inputs x 2 pipeline buffers + 1 fused staging scratch, all tk wide.
    bytes_per_col = itemsize * (4 * in_rows + z_rows_pad)
    tk_budget = vmem_budget // max(bytes_per_col, 1)
    tk_hbm = (16 * 1024 * 1024) // max(2 * in_rows * itemsize, 1)
    tk = min(tk_budget, tk_hbm, _round_up(p_cols, 128))
    if max_tile_cols is not None:
        tk = min(tk, int(max_tile_cols))
    tk = max(128, (tk // 128) * 128)

    nk = pl.cdiv(p_cols, tk)             # total tiles along folded P
    n_split = 2 if nk >= 2 else 1        # leading "parallel" axis (v7x megacore)
    nk_per = pl.cdiv(nk, n_split)

    if n_split * nk_per != nk:
        # Ragged split: clamp the ghost tile's block index (its data is fully
        # masked in-kernel anyway).
        def in_map(c, k):
            return (0, jnp.minimum(c * nk_per + k, nk - 1))
    else:
        def in_map(c, k):
            return (0, c * nk_per + k)

    kernel = functools.partial(
        _gram_kernel, nf=nf, r_off=r_off, tk=tk, p_cols=p_cols, nk_per=nk_per)

    cost = pl.CostEstimate(
        flops=2 * z_rows * z_rows * p_cols,
        transcendentals=0,
        bytes_accessed=2 * n * p * itemsize + n_split * z_rows * z_rows * 4)

    grams = pl.pallas_call(
        kernel,
        out_shape=jax.ShapeDtypeStruct((n_split, z_rows, z_rows), jnp.float32),
        grid_spec=pltpu.PrefetchScalarGridSpec(
            num_scalar_prefetch=0,
            grid=(n_split, nk_per),
            in_specs=[
                pl.BlockSpec((nf, tk), in_map),   # teacher tile
                pl.BlockSpec((nf, tk), in_map),   # student tile
            ],
            out_specs=pl.BlockSpec((1, z_rows, z_rows), lambda c, k: (c, 0, 0)),
            scratch_shapes=[
                pltpu.VMEM((z_rows, tk), dtype),  # fused Z staging buffer
            ],
        ),
        compiler_params=pltpu.CompilerParams(
            dimension_semantics=("parallel", "arbitrary"),
            vmem_limit_bytes=vmem_limit),
        cost_estimate=cost,
    )(t_f, s_f)

    # ---- tiny epilogue (O((2*N*F)^2) elements) in plain JAX: combine per-core
    # partial grams, un-fold via FxF block traces, normalize, form the loss.
    g_all = jnp.sum(grams, axis=0)
    g_t = g_all[0:nf, 0:nf]
    g_s = g_all[r_off:r_off + nf, r_off:r_off + nf]

    def unfold(gb):
        if fold == 1:
            return gb
        return jnp.trace(gb.reshape(n, fold, n, fold), axis1=1, axis2=3)

    gram_x = unfold(g_t)   # teacher gram, (N, N)
    gram_y = unfold(g_s)   # student gram, (N, N)
    if with_l2_norm:
        gram_x = gram_x / jnp.sqrt(jnp.diagonal(gram_x))[:, None]
        gram_y = gram_y / jnp.sqrt(jnp.diagonal(gram_y))[:, None]

    # trace(A @ B^T) == sum(A * B)
    num = jnp.sum(gram_x * gram_y)
    den = jnp.sqrt(jnp.sum(gram_x * gram_x) * jnp.sum(gram_y * gram_y))
    return float(intra_weight) * (-(num / den))


def _reference(student_logits, teacher_logits, intra_weight=15.0,
               with_l2_norm=True):
    n = student_logits.shape[0]
    X = np.asarray(jnp.asarray(teacher_logits, jnp.float32)).reshape(n, -1)
    Y = np.asarray(jnp.asarray(student_logits, jnp.float32)).reshape(n, -1)
    X = X.astype(np.float64)
    Y = Y.astype(np.float64)
    gX = X @ X.T
    gY = Y @ Y.T
    if with_l2_norm:
        gX = gX / np.sqrt(np.diag(gX))[:, None]
        gY = gY / np.sqrt(np.diag(gY))[:, None]
    cka = np.trace(gX @ gY.T) / np.sqrt(
        np.trace(gX @ gX.T) * np.trace(gY @ gY.T))
    return intra_weight * (-cka)


if __name__ == "__main__":
    key = jax.random.PRNGKey(0)
    k1, k2, k3, k4, k5, k6 = jax.random.split(key, 6)

    # 1) NCHW logits, P % 8 == 0: exercises the sublane fold, single tile.
    s1 = jax.random.normal(k1, (2, 4, 16, 16), dtype=jnp.float32)
    t1 = jax.random.normal(k2, (2, 4, 16, 16), dtype=jnp.float32)
    l1 = jax.block_until_ready(center_kernel_alignment_seg(s1, t1))
    r1 = _reference(s1, t1)
    assert np.allclose(np.asarray(l1), r1, rtol=1e-4, atol=1e-4), (l1, r1)

    # 2) odd P (no fold): multi-tile accumulation, 2-way core split with a
    #    clamped ghost tile and a masked partial tail tile.
    s2 = jax.random.normal(k3, (3, 5, 13, 17), dtype=jnp.float32)
    t2 = jax.random.normal(k4, (3, 5, 13, 17), dtype=jnp.float32)
    l2 = jax.block_until_ready(
        center_kernel_alignment_seg(s2, t2, max_tile_cols=256))
    r2 = _reference(s2, t2)
    assert np.allclose(np.asarray(l2), r2, rtol=1e-4, atol=1e-4), (l2, r2)

    # 3) bf16 streaming path with fold + multi-tile + 2-way split.
    s3 = jax.random.normal(k5, (2, 8, 32, 32), dtype=jnp.float32).astype(jnp.bfloat16)
    t3 = jax.random.normal(k6, (2, 8, 32, 32), dtype=jnp.float32).astype(jnp.bfloat16)
    l3 = jax.block_until_ready(
        center_kernel_alignment_seg(s3, t3, max_tile_cols=256))
    r3 = _reference(s3, t3)
    assert np.allclose(np.asarray(l3), r3, rtol=2e-3, atol=2e-3), (l3, r3)

    print("KERNEL_OK")
</pallas_src>

<mosaic_0001>
module attributes {stable_mosaic.version = 11 : i64} {
  func.func @_gram_kernel(%arg0: i32, %arg1: i32, %arg2: memref<16x128xf32, #tpu.memory_space<vmem>>, %arg3: memref<16x128xf32, #tpu.memory_space<vmem>>, %arg4: memref<1x32x32xf32, #tpu.memory_space<vmem>>, %arg5: memref<32x128xf32, #tpu.memory_space<vmem>>) attributes {dimension_semantics = [#tpu.dimension_semantics<parallel>, #tpu.dimension_semantics<arbitrary>], iteration_bounds = array<i64: 1, 1>, scalar_prefetch = 0 : i64, scratch_operands = 1 : i64, tpu.core_type = #tpu.core_type<tc>, window_params = [{transform_indices = @transform_0, window_bounds = array<i64: 16, 128>}, {transform_indices = @transform_1, window_bounds = array<i64: 16, 128>}, {transform_indices = @transform_2, window_bounds = array<i64: 1, 32, 32>}]} {
    %c0_i32 = arith.constant 0 : i32
    %0 = arith.cmpi eq, %arg1, %c0_i32 : i32
    %1 = arith.extui %0 : i1 to i32
    %c0_i32_0 = arith.constant 0 : i32
    %2 = arith.cmpi ne, %1, %c0_i32_0 : i32
    scf.if %2 {
      %cst = arith.constant 0.000000e+00 : f32
      %17 = vector.broadcast %cst : f32 to vector<1x32x32xf32>
      %c0_12 = arith.constant 0 : index
      %c0_13 = arith.constant 0 : index
      %c0_14 = arith.constant 0 : index
      %18 = vector.load %arg4[%c0_12, %c0_13, %c0_14] : memref<1x32x32xf32, #tpu.memory_space<vmem>>, vector<1x32x32xf32>
      tpu.vector_store %arg4[%c0_12, %c0_13, %c0_14], %17 {strides = array<i32>} : memref<1x32x32xf32, #tpu.memory_space<vmem>>, vector<1x32x32xf32>,
    } else {
    }
    %c0 = arith.constant 0 : index
    %c0_1 = arith.constant 0 : index
    %3 = vector.load %arg2[%c0, %c0_1] : memref<16x128xf32, #tpu.memory_space<vmem>>, vector<16x128xf32>
    %c0_2 = arith.constant 0 : index
    %c0_3 = arith.constant 0 : index
    %4 = vector.load %arg5[%c0_2, %c0_3] : memref<32x128xf32, #tpu.memory_space<vmem>>, vector<16x128xf32>
    tpu.vector_store %arg5[%c0_2, %c0_3], %3 {strides = array<i32>} : memref<32x128xf32, #tpu.memory_space<vmem>>, vector<16x128xf32>,
    %c0_4 = arith.constant 0 : index
    %c0_5 = arith.constant 0 : index
    %5 = vector.load %arg3[%c0_4, %c0_5] : memref<16x128xf32, #tpu.memory_space<vmem>>, vector<16x128xf32>
    %c16 = arith.constant 16 : index
    %c0_6 = arith.constant 0 : index
    %6 = vector.load %arg5[%c16, %c0_6] : memref<32x128xf32, #tpu.memory_space<vmem>>, vector<16x128xf32>
    tpu.vector_store %arg5[%c16, %c0_6], %5 {strides = array<i32>} : memref<32x128xf32, #tpu.memory_space<vmem>>, vector<16x128xf32>,
    %c1_i32 = arith.constant 1 : i32
    %7 = arith.muli %arg0, %c1_i32 : i32
    %8 = arith.addi %7, %arg1 : i32
    %c128_i32 = arith.constant 128 : i32
    %9 = arith.muli %8, %c128_i32 : i32
    %c128_i32_7 = arith.constant 128 : i32
    %10 = arith.subi %c128_i32_7, %9 : i32
    %c128_i32_8 = arith.constant 128 : i32
    %11 = arith.cmpi sge, %10, %c128_i32_8 : i32
    %12 = arith.extui %11 : i1 to i32
    %c0_i32_9 = arith.constant 0 : i32
    %13 = arith.cmpi ne, %12, %c0_i32_9 : i32
    scf.if %13 {
      %c0_12 = arith.constant 0 : index
      %c0_13 = arith.constant 0 : index
      %17 = vector.load %arg5[%c0_12, %c0_13] : memref<32x128xf32, #tpu.memory_space<vmem>>, vector<32x128xf32>
      %c0_14 = arith.constant 0 : index
      %c0_15 = arith.constant 0 : index
      %c0_16 = arith.constant 0 : index
      %18 = vector.load %arg4[%c0_14, %c0_15, %c0_16] : memref<1x32x32xf32, #tpu.memory_space<vmem>>, vector<1x32x32xf32>
      %19 = vector.shape_cast %18 : vector<1x32x32xf32> to vector<32x32xf32>
      %cst = arith.constant dense<0.000000e+00> : vector<32x32xf32>
      %20 = tpu.matmul %17, %17, %cst {dimension_numbers = #tpu.dot_dimension_numbers<[1], [1], [0], [0], [0, 0, 1, 0], [], []>} : vector<32x128xf32>, vector<32x128xf32>, vector<32x32xf32> -> vector<32x32xf32>
      %21 = arith.addf %19, %20 : vector<32x32xf32>
      %c0_17 = arith.constant 0 : index
      %c0_18 = arith.constant 0 : index
      %c0_19 = arith.constant 0 : index
      %22 = vector.load %arg4[%c0_17, %c0_18, %c0_19] : memref<1x32x32xf32, #tpu.memory_space<vmem>>, vector<1x32x32xf32>
      %23 = vector.shape_cast %22 : vector<1x32x32xf32> to vector<32x32xf32>
      %24 = vector.shape_cast %21 : vector<32x32xf32> to vector<1x32x32xf32>
      tpu.vector_store %arg4[%c0_17, %c0_18, %c0_19], %24 {strides = array<i32>} : memref<1x32x32xf32, #tpu.memory_space<vmem>>, vector<1x32x32xf32>,
    } else {
    }
    %c128_i32_10 = arith.constant 128 : i32
    %14 = arith.cmpi slt, %10, %c128_i32_10 : i32
    %15 = arith.extui %14 : i1 to i32
    %c0_i32_11 = arith.constant 0 : i32
    %16 = arith.cmpi ne, %15, %c0_i32_11 : i32
    scf.if %16 {
      %c0_12 = arith.constant 0 : index
      %c0_13 = arith.constant 0 : index
      %17 = vector.load %arg5[%c0_12, %c0_13] : memref<32x128xf32, #tpu.memory_space<vmem>>, vector<32x128xf32>
      %18 = tpu.iota {dimensions = array<i32: 1>} : vector<32x128xi32>
      %19 = vector.broadcast %10 : i32 to vector<32x128xi32>
      %20 = arith.cmpi slt, %18, %19 : vector<32x128xi32>
      %cst = arith.constant 0.000000e+00 : f32
      %21 = vector.broadcast %cst : f32 to vector<32x128xf32>
      %22 = arith.select %20, %17, %21 : vector<32x128xi1>, vector<32x128xf32>
      %c0_14 = arith.constant 0 : index
      %c0_15 = arith.constant 0 : index
      %c0_16 = arith.constant 0 : index
      %23 = vector.load %arg4[%c0_14, %c0_15, %c0_16] : memref<1x32x32xf32, #tpu.memory_space<vmem>>, vector<1x32x32xf32>
      %24 = vector.shape_cast %23 : vector<1x32x32xf32> to vector<32x32xf32>
      %cst_17 = arith.constant dense<0.000000e+00> : vector<32x32xf32>
      %25 = tpu.matmul %22, %22, %cst_17 {dimension_numbers = #tpu.dot_dimension_numbers<[1], [1], [0], [0], [0, 0, 1, 0], [], []>} : vector<32x128xf32>, vector<32x128xf32>, vector<32x32xf32> -> vector<32x32xf32>
      %26 = arith.addf %24, %25 : vector<32x32xf32>
      %c0_18 = arith.constant 0 : index
      %c0_19 = arith.constant 0 : index
      %c0_20 = arith.constant 0 : index
      %27 = vector.load %arg4[%c0_18, %c0_19, %c0_20] : memref<1x32x32xf32, #tpu.memory_space<vmem>>, vector<1x32x32xf32>
      %28 = vector.shape_cast %27 : vector<1x32x32xf32> to vector<32x32xf32>
      %29 = vector.shape_cast %26 : vector<32x32xf32> to vector<1x32x32xf32>
      tpu.vector_store %arg4[%c0_18, %c0_19, %c0_20], %29 {strides = array<i32>} : memref<1x32x32xf32, #tpu.memory_space<vmem>>, vector<1x32x32xf32>,
    } else {
    }
    return
  }
  func.func @transform_0(%arg0: i32, %arg1: i32) -> (i32, i32) {
    %c1_i32 = arith.constant 1 : i32
    %0 = arith.muli %arg0, %c1_i32 : i32
    %1 = arith.addi %0, %arg1 : i32
    %c0_i32 = arith.constant 0 : i32
    %c0_i32_0 = arith.constant 0 : i32
    return %c0_i32, %1 : i32, i32
  }
  func.func @transform_1(%arg0: i32, %arg1: i32) -> (i32, i32) {
    %c1_i32 = arith.constant 1 : i32
    %0 = arith.muli %arg0, %c1_i32 : i32
    %1 = arith.addi %0, %arg1 : i32
    %c0_i32 = arith.constant 0 : i32
    %c0_i32_0 = arith.constant 0 : i32
    return %c0_i32, %1 : i32, i32
  }
  func.func @transform_2(%arg0: i32, %arg1: i32) -> (i32, i32, i32) {
    %c0_i32 = arith.constant 0 : i32
    %c0_i32_0 = arith.constant 0 : i32
    %c0_i32_1 = arith.constant 0 : i32
    return %arg0, %c0_i32, %c0_i32_0 : i32, i32, i32
  }
}

</mosaic_0001>

<bundles_post_ra>
// kernel: tpu_custom_call.1
= control target key start
LH: loop header
LB: loop body
LE: loop exit
PB: predicated region body
PF: predicated region fallthrough
CT: control target
= control target key end

     0   :  { %7 = vsyncpa [#allocation4], 0  ;;  %s492_s0 = inlined_call_operand.hbm [shape: f32[16,128], index: 0, kind: input, shape index: {}]   ;;  %s493_s1 = inlined_call_operand.hbm [shape: f32[16,128], index: 1, kind: input, shape index: {}]   ;;  %s494_s2 = inlined_call_operand.hbm [shape: f32[1,32,32], index: 2, kind: output, shape index: {}]  }
   0x1   :  { %8 = vsyncpa [#allocation7], 0 }
   0x2   :  { %9 = vsyncpa [#allocation5], 0  ;;  %s418_s9 = smov [#allocation3]   ;;  %s346_s13 = scalar_lea.hbm %s492_s0, 256 }
   0x3   :  { %s18_s10 = sshll.u32 %s418_s9, 4  ;;  %p347_p0 = scmp.ne.s32.totalorder %s492_s0, %s346_s13  ;;  %s19_s10 = int_to_ptr.vmem [resolvable:$true] %s18_s10 }
   0x4   :  { %p350_p1 = scmp.lt.u32.totalorder %s346_s13, %s492_s0 }
   0x6   :  { %p352_p2 = pnand %p350_p1, %p347_p0 }
   0x8   :  { %355 = shalt.err (!%p352_p2)
}
   0x9   :  { %s356_s18 = scalar_lea.vmem %s19_s10, 256  ;;  %p361_p4 = scmp.lt.s32.totalorder %s19_s10, %s19_s10 }
   0xa   :  { %p357_p3 = scmp.ne.s32.totalorder %s19_s10, %s356_s18  ;;  %p362_p5 = scmp.lt.s32.totalorder %s356_s18, %s356_s18 }
   0xc   :  { %p363_p6 = por %p362_p5, %p361_p4 }
   0xe   :  { %p364_p7 = pnand %p363_p6, %p357_p3 }
  0x10   :  { %367 = shalt.err (!%p364_p7)
}
  0x11   :  { %s419_s19 = smov 128   ;;  %s420_s20 = smov 8  }
  0x12   :  { %24 = dma.hbm_to_vmem [thread:$0]  %s492_s0, 256, %s19_s10, [#allocation4], %s419_s19, %s419_s19, %s420_s20  }
  0x13   :  { %s421_s23 = smov [#allocation6]   ;;  %s368_s27 = scalar_lea.hbm %s493_s1, 256 }
  0x14   :  { %s33_s24 = sshll.u32 %s421_s23, 4  ;;  %p369_p8 = scmp.ne.s32.totalorder %s493_s1, %s368_s27  ;;  %s34_s24 = int_to_ptr.vmem [resolvable:$true] %s33_s24 }
  0x15   :  { %p372_p9 = scmp.lt.u32.totalorder %s368_s27, %s493_s1 }
  0x17   :  { %p374_p10 = pnand %p372_p9, %p369_p8 }
  0x19   :  { %377 = shalt.err (!%p374_p10)
}
  0x1a   :  { %s378_s4 = scalar_lea.vmem %s34_s24, 256  ;;  %p383_p12 = scmp.lt.s32.totalorder %s34_s24, %s34_s24 }
  0x1b   :  { %p379_p11 = scmp.ne.s32.totalorder %s34_s24, %s378_s4  ;;  %p384_p13 = scmp.lt.s32.totalorder %s378_s4, %s378_s4 }
  0x1d   :  { %p385_p0 = por %p384_p13, %p383_p12 }
  0x1f   :  { %p386_p1 = pnand %p385_p0, %p379_p11 }
  0x21   :  { %389 = shalt.err (!%p386_p1)
}
  0x22   :  { %39 = dma.hbm_to_vmem [thread:$0]  %s493_s1, 256, %s34_s24, [#allocation7], %s419_s19, %s419_s19, %s420_s20  }
  0x23   :  { %412 = dma.done.wait [#allocation4], 256  }
  0x24   :  { %413 = vsyncadd [#allocation4], 4294967040 }
  0x25   :  { %414 = dma.done.wait [#allocation7], 256  }
  0x26   :  { %415 = vsyncadd [#allocation7], 4294967040  ;;  %vm52_vm0 = vcmask 261120   ;;  %v422_v0 = vmov 0.0   ;;  %v57_v1 = vld [vmem:[#allocation3] sm:$0xff]  ;;  %v58_v2 = vld [vmem:[#allocation3 + $0x8] sm:$0xff] }
  0x27   :  { %54 = vst.msk [vmem:[#allocation8 + $0x8] sm:$0xff] %vm52_vm0, %v422_v0  ;;  %53 = vst.msk [vmem:[#allocation8] sm:$0xff] %vm52_vm0, %v422_v0  ;;  %v61_v3 = vld [vmem:[#allocation6] sm:$0xff]  ;;  %v328_v4 = vpack.c.bf16 %v58_v2, %v57_v1  ;;  %v62_v5 = vld [vmem:[#allocation6 + $0x8] sm:$0xff]  ;;  %322 = vmatprep.mubr.f32.mxu0 %v57_v1  ;;  %s423_s1 = smov [#allocation8]  }
  0x28   :  { %55 = vst.msk [vmem:[#allocation8 + $0x10] sm:$0xff] %vm52_vm0, %v422_v0  ;;  %56 = vst.msk [vmem:[#allocation8 + $0x18] sm:$0xff] %vm52_vm0, %v422_v0  ;;  %325 = vmatprep.mubr.f32.mxu1 %v61_v3  ;;  %v332_v6 = vpack.c.bf16 %v62_v5, %v61_v3  ;;  %s293_s6 = sshll.u32 %s423_s1, 4  ;;  %s294_s6 = int_to_ptr.vmem [resolvable:$true] %s293_s6 }
  0x29   :  { %329 = vmatprep.subr.bf16.mxu0 %v328_v4  ;;  %336 = vmatprep.subr.bf16.mxu1 %v328_v4  ;;  %s390_s7 = scalar_lea.vmem %s294_s6, 512  ;;  %p395_p3 = scmp.lt.s32.totalorder %s294_s6, %s294_s6 }
  0x2a   :  { %331 = vmatpush3.bf16.xpose.msra.mxu0 %v328_v4  ;;  %338 = vmatpush3.bf16.xpose.msra.mxu1 %v328_v4  ;;  %p391_p2 = scmp.ne.s32.totalorder %s294_s6, %s390_s7  ;;  %p396_p4 = scmp.lt.s32.totalorder %s390_s7, %s390_s7 }
  0x2b   :  { %333 = vmatprep.subr.bf16.mxu0 %v332_v6  ;;  %337 = vmatprep.subr.bf16.mxu1 %v332_v6 }
  0x2c   :  { %p397_p5 = por %p396_p4, %p395_p3 }
  0x2e   :  { %v77_v7 = vld [vmem:[#allocation8 + $0x8] sm:$0xff]  ;;  %v76_v9 = vld [vmem:[#allocation8] sm:$0xff]  ;;  %p398_p6 = pnand %p397_p5, %p391_p2 }
  0x2f   :  { %v79_v8 = vld [vmem:[#allocation8 + $0x18] sm:$0xff]  ;;  %v78_v10 = vld [vmem:[#allocation8 + $0x10] sm:$0xff] }
  0x32   :  { %335 = vmatpush3.bf16.xpose.msra.mxu0 %v332_v6  ;;  %339 = vmatpush3.bf16.xpose.msra.mxu1 %v332_v6 }
  0x39   :  { %323 = vmatmul.mubr.f32.vlgmr.msra.gmra.mrb[0].mxu0 %v58_v2  ;;  %326 = vmatmul.mubr.f32.vlgmr.msra.gmra.mrb[0].mxu1 %v62_v5 }
 0x10c   :  { %v324_v11 = vpop.f32.mrb[0].mxu0  ;;  %v327_v12 = vpop.f32.mrb[0].mxu1 }
 0x10d   :  { %v166_v13 = vadd.f32 %v324_v11, %v77_v7  ;;  %v168_v14 = vadd.f32 %v327_v12, %v79_v8  ;;  %v146_v15 = vpop.f32.mrb[1].mxu0  ;;  %v156_v16 = vpop.f32.mrb[1].mxu1 }
 0x10e   :  { %v165_v17 = vadd.f32 %v146_v15, %v76_v9  ;;  %v167_v18 = vadd.f32 %v156_v16, %v78_v10 }
 0x10f   :  { %171 = vst.msk [vmem:[#allocation8 + $0x8] sm:$0xff] %vm52_vm0, %v166_v13  ;;  %173 = vst.msk [vmem:[#allocation8 + $0x18] sm:$0xff] %vm52_vm0, %v168_v14 }
 0x110   :  { %170 = vst.msk [vmem:[#allocation8] sm:$0xff] %vm52_vm0, %v165_v17  ;;  %172 = vst.msk [vmem:[#allocation8 + $0x10] sm:$0xff] %vm52_vm0, %v167_v18 }
 0x111   :  { %401 = shalt.err (!%p398_p6)
}
 0x112   :  { %s402_s10 = scalar_lea.hbm %s494_s2, 512 }
 0x113   :  { %p403_p7 = scmp.ne.s32.totalorder %s494_s2, %s402_s10  ;;  %p406_p8 = scmp.lt.u32.totalorder %s402_s10, %s494_s2 }
 0x115   :  { %p408_p9 = pnand %p406_p8, %p403_p7 }
 0x117   :  { %411 = shalt.err (!%p408_p9)
}
 0x118   :  { %299 = dma.vmem_to_hbm [thread:$0]  %s294_s6, 512, %s494_s2, [#allocation5], %s419_s19, %s419_s19, %s420_s20  }
 0x119   :  { %416 = dma.done.wait [#allocation5], 512  }
 0x11a   :  { %417 = vsyncadd [#allocation5], 4294966784 }
 0x11b   :  { %303 = vsyncpa [#allocation4], 1 }
 0x11c   :  { %304 = vsyncpa [#allocation7], 1 }
 0x11d   :  { %305 = vsyncpa [#allocation5], 1 }

</bundles_post_ra>
